<compile_context>
chip_gen: v6e
topology: v6e:2x2x1
jax: 0.10.0
libtpu: 0.0.40
codegen_flags: <defaults>
</compile_context>

<pallas_src>
import jax
import jax.numpy as jnp
from jax.experimental import pallas as pl
from jax.experimental.pallas import tpu as pltpu

# Constants mirrored from the PyTorch script
lim_unigram = 1
N_FEATURE = 2 * lim_unigram + 1      # 3
N_OUTPUT = 2
N_HIDDEN = 32
BATCH = 10


def ucl_nn_kernel(x_ref, params_ref, o_ref):
    """params_ref rows (lane width = n_hidden):
         [0:F]   w1^T rows        (F, H)
         [F]     b1               (1, H)
         [F+1]   w2[:,1]-w2[:,0]  (1, H)
         [F+2]   (b2[1]-b2[0]) at lane 0, zeros elsewhere
    """
    F = x_ref.shape[1]
    x = x_ref[...]                                          # (Bp, F)

    # hidden = relu(x @ W1^T + b1): VPU broadcast-multiply-add, unrolled over F
    h = params_ref[F:F + 1, :]                              # b1   (1, H)
    for f in range(F):                                      # static unroll
        h = h + x[:, f:f + 1] * params_ref[f:f + 1, :]      # (Bp, H)
    h = jnp.maximum(h, 0.0)

    # logit difference (class1 - class0): single XLU lane reduction,
    # bias difference rides along in the same summand (one-hot at lane 0).
    diff = jnp.sum(h * params_ref[F + 1:F + 2, :] + params_ref[F + 2:F + 3, :],
                   axis=-1, keepdims=True)                  # (Bp, 1)

    # 2-class softmax == sigmoid of the logit difference
    p1 = 1.0 / (1.0 + jnp.exp(-diff))                       # (Bp, 1)
    col = jax.lax.broadcasted_iota(jnp.int32, o_ref.shape, 1)
    o_ref[...] = jnp.where(col == 0, 1.0 - p1, p1).astype(o_ref.dtype)


@jax.jit
def ucl_nn_forward(x, w1_t, b1, w2_t, b2):
    B, F = x.shape
    H = w1_t.shape[1]
    O = w2_t.shape[1]
    assert O == 2, "kernel exploits the 2-class softmax == sigmoid identity"

    # Pad batch to a sublane multiple.
    Bp = max(8, ((B + 7) // 8) * 8)
    x_p = jnp.zeros((Bp, F), jnp.float32).at[:B, :].set(x.astype(jnp.float32))

    # Pack all parameters into one sublane-aligned (8, H) f32 slab.
    b2_flat = b2.reshape(O)
    params = jnp.zeros((8, H), jnp.float32)
    params = params.at[0:F, :].set(w1_t)
    params = params.at[F, :].set(b1.reshape(H))
    params = params.at[F + 1, :].set(w2_t[:, 1] - w2_t[:, 0])
    params = params.at[F + 2, 0].set(b2_flat[1] - b2_flat[0])

    out = pl.pallas_call(
        ucl_nn_kernel,
        out_shape=jax.ShapeDtypeStruct((Bp, O), jnp.float32),
        in_specs=[
            pl.BlockSpec(memory_space=pltpu.MemorySpace.VMEM),   # x
            pl.BlockSpec(memory_space=pltpu.MemorySpace.VMEM),   # packed params
        ],
        out_specs=pl.BlockSpec(memory_space=pltpu.MemorySpace.VMEM),
    )(x_p, params)
    return out[:B]


def init_params(key):
    """Deterministic init mimicking torch.nn.Linear's U(-1/sqrt(fan_in), +)."""
    k1, k2, k3, k4 = jax.random.split(key, 4)
    bound1 = 1.0 / jnp.sqrt(N_FEATURE)
    bound2 = 1.0 / jnp.sqrt(N_HIDDEN)
    # stored already transposed: (in_features, out_features)
    w1_t = jax.random.uniform(k1, (N_FEATURE, N_HIDDEN), jnp.float32, -bound1, bound1)
    b1 = jax.random.uniform(k2, (1, N_HIDDEN), jnp.float32, -bound1, bound1)
    w2_t = jax.random.uniform(k3, (N_HIDDEN, N_OUTPUT), jnp.float32, -bound2, bound2)
    b2 = jax.random.uniform(k4, (1, N_OUTPUT), jnp.float32, -bound2, bound2)
    return w1_t, b1, w2_t, b2


def reference_forward(x, w1_t, b1, w2_t, b2):
    hp = jax.lax.Precision.HIGHEST
    h = jnp.maximum(jnp.dot(x, w1_t, precision=hp) + b1, 0.0)
    logits = jnp.dot(h, w2_t, precision=hp) + b2
    return jax.nn.softmax(logits, axis=-1)


if __name__ == "__main__":
    key = jax.random.PRNGKey(0)
    kx, kp = jax.random.split(key)
    x = jax.random.normal(kx, (BATCH, N_FEATURE), jnp.float32)
    w1_t, b1, w2_t, b2 = init_params(kp)

    out = jax.block_until_ready(ucl_nn_forward(x, w1_t, b1, w2_t, b2))

    ref = reference_forward(x, w1_t, b1, w2_t, b2)
    assert out.shape == (BATCH, N_OUTPUT)
    assert jnp.allclose(out, ref, atol=1e-5, rtol=1e-5), "mismatch vs reference"
    # rows of a softmax sum to 1
    assert jnp.allclose(jnp.sum(out, axis=-1), 1.0, atol=1e-5)

    print("KERNEL_OK")
</pallas_src>

<mosaic_0001>
module attributes {stable_mosaic.version = 11 : i64} {
  func.func @ucl_nn_kernel(%arg0: memref<16x3xf32, #tpu.memory_space<vmem>>, %arg1: memref<8x32xf32, #tpu.memory_space<vmem>>, %arg2: memref<16x2xf32, #tpu.memory_space<vmem>>) attributes {dimension_semantics = [], scalar_prefetch = 0 : i64, scratch_operands = 0 : i64, tpu.core_type = #tpu.core_type<tc>} {
    %c0 = arith.constant 0 : index
    %c0_0 = arith.constant 0 : index
    %0 = vector.load %arg0[%c0, %c0_0] : memref<16x3xf32, #tpu.memory_space<vmem>>, vector<16x3xf32>
    %c3 = arith.constant 3 : index
    %c0_1 = arith.constant 0 : index
    %1 = vector.load %arg1[%c3, %c0_1] : memref<8x32xf32, #tpu.memory_space<vmem>>, vector<1x32xf32>
    %2 = vector.extract_strided_slice %0 {offsets = [0, 0], sizes = [16, 1], strides = [1, 1]} : vector<16x3xf32> to vector<16x1xf32>
    %c0_2 = arith.constant 0 : index
    %c0_3 = arith.constant 0 : index
    %3 = vector.load %arg1[%c0_2, %c0_3] : memref<8x32xf32, #tpu.memory_space<vmem>>, vector<1x32xf32>
    %4 = vector.broadcast %2 : vector<16x1xf32> to vector<16x32xf32>
    %5 = vector.broadcast %3 : vector<1x32xf32> to vector<16x32xf32>
    %6 = arith.mulf %4, %5 : vector<16x32xf32>
    %7 = vector.broadcast %1 : vector<1x32xf32> to vector<16x32xf32>
    %8 = arith.addf %7, %6 : vector<16x32xf32>
    %9 = vector.extract_strided_slice %0 {offsets = [0, 1], sizes = [16, 1], strides = [1, 1]} : vector<16x3xf32> to vector<16x1xf32>
    %c1 = arith.constant 1 : index
    %c0_4 = arith.constant 0 : index
    %10 = vector.load %arg1[%c1, %c0_4] : memref<8x32xf32, #tpu.memory_space<vmem>>, vector<1x32xf32>
    %11 = vector.broadcast %9 : vector<16x1xf32> to vector<16x32xf32>
    %12 = vector.broadcast %10 : vector<1x32xf32> to vector<16x32xf32>
    %13 = arith.mulf %11, %12 : vector<16x32xf32>
    %14 = arith.addf %8, %13 : vector<16x32xf32>
    %15 = vector.extract_strided_slice %0 {offsets = [0, 2], sizes = [16, 1], strides = [1, 1]} : vector<16x3xf32> to vector<16x1xf32>
    %c2 = arith.constant 2 : index
    %c0_5 = arith.constant 0 : index
    %16 = vector.load %arg1[%c2, %c0_5] : memref<8x32xf32, #tpu.memory_space<vmem>>, vector<1x32xf32>
    %17 = vector.broadcast %15 : vector<16x1xf32> to vector<16x32xf32>
    %18 = vector.broadcast %16 : vector<1x32xf32> to vector<16x32xf32>
    %19 = arith.mulf %17, %18 : vector<16x32xf32>
    %20 = arith.addf %14, %19 : vector<16x32xf32>
    %cst = arith.constant 0.000000e+00 : f32
    %21 = vector.broadcast %cst : f32 to vector<16x32xf32>
    %22 = arith.maximumf %20, %21 : vector<16x32xf32>
    %c4 = arith.constant 4 : index
    %c0_6 = arith.constant 0 : index
    %23 = vector.load %arg1[%c4, %c0_6] : memref<8x32xf32, #tpu.memory_space<vmem>>, vector<1x32xf32>
    %24 = vector.broadcast %23 : vector<1x32xf32> to vector<16x32xf32>
    %25 = arith.mulf %22, %24 : vector<16x32xf32>
    %c5 = arith.constant 5 : index
    %c0_7 = arith.constant 0 : index
    %26 = vector.load %arg1[%c5, %c0_7] : memref<8x32xf32, #tpu.memory_space<vmem>>, vector<1x32xf32>
    %27 = vector.broadcast %26 : vector<1x32xf32> to vector<16x32xf32>
    %28 = arith.addf %25, %27 : vector<16x32xf32>
    %cst_8 = arith.constant dense<0.000000e+00> : vector<16xf32>
    %29 = vector.multi_reduction <add>, %28, %cst_8 [1] : vector<16x32xf32> to vector<16xf32>
    %30 = vector.shape_cast %29 : vector<16xf32> to vector<16x1xf32>
    %cst_9 = arith.constant 0.000000e+00 : f32
    %31 = vector.broadcast %cst_9 : f32 to vector<16x1xf32>
    %32 = arith.subf %31, %30 : vector<16x1xf32>
    %33 = math.exp %32 : vector<16x1xf32>
    %cst_10 = arith.constant 1.000000e+00 : f32
    %34 = vector.broadcast %cst_10 : f32 to vector<16x1xf32>
    %35 = arith.addf %34, %33 : vector<16x1xf32>
    %cst_11 = arith.constant 1.000000e+00 : f32
    %36 = vector.broadcast %cst_11 : f32 to vector<16x1xf32>
    %37 = arith.divf %36, %35 : vector<16x1xf32>
    %38 = tpu.iota {dimensions = array<i32: 1>} : vector<16x2xi32>
    %c0_i32 = arith.constant 0 : i32
    %39 = vector.broadcast %c0_i32 : i32 to vector<16x2xi32>
    %40 = arith.cmpi eq, %38, %39 : vector<16x2xi32>
    %cst_12 = arith.constant 1.000000e+00 : f32
    %41 = vector.broadcast %cst_12 : f32 to vector<16x1xf32>
    %42 = arith.subf %41, %37 : vector<16x1xf32>
    %43 = vector.shape_cast %42 : vector<16x1xf32> to vector<16x1xf32>
    %44 = vector.broadcast %43 : vector<16x1xf32> to vector<16x2xf32>
    %45 = vector.shape_cast %37 : vector<16x1xf32> to vector<16x1xf32>
    %46 = vector.broadcast %45 : vector<16x1xf32> to vector<16x2xf32>
    %47 = arith.select %40, %44, %46 : vector<16x2xi1>, vector<16x2xf32>
    %c0_13 = arith.constant 0 : index
    %c0_14 = arith.constant 0 : index
    %48 = vector.load %arg2[%c0_13, %c0_14] : memref<16x2xf32, #tpu.memory_space<vmem>>, vector<16x2xf32>
    tpu.vector_store %arg2[%c0_13, %c0_14], %47 {strides = array<i32>} : memref<16x2xf32, #tpu.memory_space<vmem>>, vector<16x2xf32>,
    return
  }
}

</mosaic_0001>

<bundles_post_ra>
// kernel: ucl_nn_forward.1
= control target key start
LH: loop header
LB: loop body
LE: loop exit
PB: predicated region body
PF: predicated region fallthrough
CT: control target
= control target key end

     0   :  { %v141_v0 = vmov 1   ;;  %v142_v1 = vmov 0   ;;  %v143_v4 = vmov 2   ;;  %vm87_vm0 = vcmask 261120   ;;  %s189_s0 = inlined_call_operand.vmem [shape: f32[16,3], index: 0, kind: input, shape index: {}]   ;;  %s190_s1 = inlined_call_operand.vmem [shape: f32[8,32], index: 1, kind: input, shape index: {}]   ;;  %s191_s2 = inlined_call_operand.vmem [shape: f32[16,2], index: 2, kind: output, shape index: {}]  }
   0x1   :  { %130 = vset.pattern.permute.xlu1 %v141_v0  ;;  %129 = vset.pattern.permute.xlu0 %v142_v1  ;;  %v11_v2 = vld [vmem:[%s189_s0] sm:$0xff]  ;;  %v12_v3 = vld [vmem:[%s189_s0 + $0x8] sm:$0xff]  ;;  %v106_v47 = vlaneseq  ;;  %vm113_vm2 = vcmask 15360  }
   0x2   :  { %39 = vperm.xlu1 %130, %v11_v2   ;;  %17 = vperm.xlu0 %129, %v11_v2   ;;  %v120_v5 = vld [vmem:[%s190_s1] ss:$0 sm:$0xff]  ;;  %v121_v9 = vld [vmem:[%s190_s1 + $0x3] ss:$0 sm:$0xff]  ;;  %v122_v12 = vld [vmem:[%s190_s1 + $0x1] ss:$0 sm:$0xff] }
   0x3   :  { %v123_v17 = vld [vmem:[%s190_s1 + $0x2] ss:$0 sm:$0xff]  ;;  %v124_v27 = vld [vmem:[%s190_s1 + $0x4] ss:$0 sm:$0xff]  ;;  %v125_v30 = vld [vmem:[%s190_s1 + $0x5] ss:$0 sm:$0xff] }
   0x4   :  { %v107_v48 = vand.u32 127, %v106_v47 }
   0x6   :  { %43 = vperm.xlu1 %130, %v12_v3   ;;  %22 = vperm.xlu0 %129, %v12_v3   ;;  %vm108_vm1 = vcmp.eq.s32.totalorder %v107_v48, 0 }
   0xa   :  { %132 = vset.pattern.permute.xlu1 %v143_v4  ;;  %131 = vset.pattern.permute.xlu0 %v143_v4 }
   0xb   :  { %60 = vperm.xlu1 %132, %v12_v3   ;;  %56 = vperm.xlu0 %131, %v11_v2  }
  0x7d   :  { %v40_v6 = vpop.permute.xlu1 %39  ;;  %v18_v7 = vpop.permute.xlu0 %17 }
  0x7e   :  { %v29_v8 = vmul.f32 %v120_v5, %v18_v7  ;;  %v50_v18 = vmul.f32 %v122_v12, %v40_v6 }
  0x80   :  { %v35_v14 = vadd.f32 %v121_v9, %v29_v8 }
  0x81   :  { %v44_v10 = vpop.permute.xlu1 %43  ;;  %v23_v11 = vpop.permute.xlu0 %22 }
  0x82   :  { %v30_v13 = vmul.f32 %v120_v5, %v23_v11  ;;  %v51_v15 = vmul.f32 %v122_v12, %v44_v10  ;;  %v52_v23 = vadd.f32 %v50_v18, %v35_v14 }
  0x84   :  { %v36_v16 = vadd.f32 %v121_v9, %v30_v13 }
  0x86   :  { %v61_v19 = vpop.permute.xlu1 %60  ;;  %v53_v20 = vadd.f32 %v51_v15, %v36_v16  ;;  %v57_v21 = vpop.permute.xlu0 %56 }
  0x87   :  { %v68_v22 = vmul.f32 %v123_v17, %v61_v19  ;;  %v67_v24 = vmul.f32 %v123_v17, %v57_v21 }
  0x89   :  { %v70_v25 = vadd.f32 %v68_v22, %v53_v20  ;;  %v69_v26 = vadd.f32 %v67_v24, %v52_v23 }
  0x8b   :  { %v72_v28 = vmax.f32 %v70_v25, 0.0  ;;  %v71_v29 = vmax.f32 %v69_v26, 0.0 }
  0x8d   :  { %v79_v31 = vmul.f32 %v124_v27, %v72_v28  ;;  %v78_v32 = vmul.f32 %v124_v27, %v71_v29 }
  0x8f   :  { %v86_v33 = vadd.f32 %v125_v30, %v79_v31  ;;  %v85_v34 = vadd.f32 %v125_v30, %v78_v32 }
  0x91   :  { %v91_v35 = vsel %vm87_vm0, %v86_v33, 0.0  ;;  %v88_v36 = vsel %vm87_vm0, %v85_v34, 0.0 }
  0x92   :  { %92 = vadd.xlane.f32.xlu0 %v91_v35  ;;  %89 = vadd.xlane.f32.xlu1 %v88_v36 }
 0x11b   :  { %v90_v37 = vpop.xlane.xlu1 %89  ;;  %v93_v38 = vpop.xlane.xlu0 %92 }
 0x11c   :  { %v94_v39 = vsub.f32 0.0, %v90_v37  ;;  %v95_v40 = vsub.f32 0.0, %v93_v38 }
 0x11e   :  { %v96_v41 = vmul.f32 1.442695, %v94_v39  ;;  %v98_v42 = vmul.f32 1.442695, %v95_v40 }
 0x120   :  { %133 = vpow2.f32 %v96_v41 }
 0x121   :  { %135 = vpow2.f32 %v98_v42 }
 0x12d   :  { %v134_v43 = vpop.eup %133 }
 0x12e   :  { %v136_v44 = vpop.eup %135  ;;  %v100_v45 = vadd.f32 1.0, %v134_v43 }
 0x12f   :  { %v101_v46 = vadd.f32 1.0, %v136_v44 }
 0x130   :  { %137 = vrcp.f32 %v100_v45 }
 0x131   :  { %139 = vrcp.f32 %v101_v46 }
 0x13d   :  { %v138_v49 = vpop.eup %137 }
 0x13e   :  { %v140_v50 = vpop.eup %139  ;;  %v109_v51 = vsub.f32 1.0, %v138_v49 }
 0x13f   :  { %v110_v52 = vsub.f32 1.0, %v140_v50 }
 0x140   :  { %v111_v53 = vsel %vm108_vm1, %v109_v51, %v138_v49 }
 0x141   :  { %114 = vst.msk [vmem:[%s191_s2] sm:$0xff] %vm113_vm2, %v111_v53  ;;  %v112_v54 = vsel %vm108_vm1, %v110_v52, %v140_v50 }
 0x142   :  { %115 = vst.msk [vmem:[%s191_s2 + $0x8] sm:$0xff] %vm113_vm2, %v112_v54 }

</bundles_post_ra>
